<compile_context>
chip_gen: v6e
topology: v6e:2x2x1
jax: 0.10.0
libtpu: 0.0.40
codegen_flags: <defaults>
</compile_context>

<pallas_src>
import jax
import jax.numpy as jnp
from jax.experimental import pallas as pl
from jax.experimental.pallas import tpu as pltpu

LANES = 128
SUBLANES = 8
MIN_BLOCK_ELEMS = SUBLANES * LANES   # 1024
MAX_TILE_R = 2048                    # 2048 x 128 f32 block = 1 MiB per input


def _num_tensorcores():
    """Best-effort TensorCore count per chip (2 on v7x, 1 on v5e/v6e).

    Defaults to 1 if the info is unavailable, which is the safe choice on
    single-core chips (no phantom-block re-reads, no extra masking)."""
    try:
        info = pltpu.get_tpu_info()
    except Exception:
        return 1
    for attr in ("num_cores", "core_count", "num_tensorcores",
                 "tensorcore_count", "cores_per_chip"):
        v = getattr(info, attr, None)
        if isinstance(v, int) and v >= 1:
            return v
    return 1


def _make_kernel(tile_r, rows, bper, need_row_mask):
    r8 = tile_r // SUBLANES

    def accumulate(pred, mask, sum_ref, cnt_ref):
        # gt == 0 at every selected position, so |pred - gt| == |pred|.
        contrib = jnp.where(mask, jnp.abs(pred.astype(jnp.float32)),
                            jnp.float32(0.0))
        ones = jnp.where(mask, jnp.float32(1.0), jnp.float32(0.0))
        # Sublane pre-reduce: (tile_r,128) -> (8,128) via pure VPU adds (the
        # leading-axis sum never crosses lanes/sublanes), so the resident
        # accumulators are one vreg each and their ld/st cost is ~amortized away.
        sum_ref[...] += contrib.reshape(r8, SUBLANES, LANES).sum(axis=0)
        cnt_ref[...] += ones.reshape(r8, SUBLANES, LANES).sum(axis=0)

    def kernel(pred_ref, gt_ref, sum_ref, cnt_ref):
        j = pl.program_id(1)

        @pl.when(j == 0)
        def _init():
            sum_ref[...] = jnp.zeros_like(sum_ref)
            cnt_ref[...] = jnp.zeros_like(cnt_ref)

        gt = gt_ref[...]          # (tile_r, LANES), native dtype
        pred = pred_ref[...]
        is_zero = gt == 0

        if need_row_mask:
            c = pl.program_id(0)
            blk = c * bper + j
            valid_rows = rows - blk * tile_r      # <= 0 for phantom blocks
            is_partial = valid_rows < tile_r

            # Fast path: full blocks accumulate unmasked (no iota / extra VALU).
            @pl.when(jnp.logical_not(is_partial))
            def _full():
                accumulate(pred, is_zero, sum_ref, cnt_ref)

            # Slow path: ragged last block / phantom re-read block. The
            # out-of-bounds tail of the input block holds unspecified data;
            # the row mask + jnp.where select keeps it from contributing.
            @pl.when(is_partial)
            def _ragged():
                row_ids = jax.lax.broadcasted_iota(jnp.int32,
                                                   (tile_r, LANES), 0)
                masked = jnp.logical_and(is_zero, row_ids < valid_rows)
                accumulate(pred, masked, sum_ref, cnt_ref)
        else:
            accumulate(pred, is_zero, sum_ref, cnt_ref)

    return kernel


def _masked_abs_sum(pred2d, gt2d, rows):
    """Streams (rows, 128) views; returns (sum |pred| where gt==0, count)."""
    tile_r = min(MAX_TILE_R, rows)               # rows is a multiple of 8
    n_blocks = pl.cdiv(rows, tile_r)
    n_cores = _num_tensorcores()
    n_split = 2 if (n_cores >= 2 and n_blocks >= 2) else 1
    bper = pl.cdiv(n_blocks, n_split)
    need_row_mask = (n_split * bper * tile_r) > rows
    has_phantom = n_split * bper > n_blocks

    def in_map(c, j):
        blk = c * bper + j
        if has_phantom:
            # Phantom grid steps re-read an already-valid block; their
            # contribution is zeroed by the in-kernel row mask.
            blk = jnp.minimum(blk, n_blocks - 1)
        return (blk, 0)

    kernel = _make_kernel(tile_r, rows, bper, need_row_mask)

    sum_part, cnt_part = pl.pallas_call(
        kernel,
        out_shape=(
            jax.ShapeDtypeStruct((n_split * SUBLANES, LANES), jnp.float32),
            jax.ShapeDtypeStruct((n_split * SUBLANES, LANES), jnp.float32),
        ),
        grid_spec=pltpu.PrefetchScalarGridSpec(
            num_scalar_prefetch=0,
            grid=(n_split, bper),
            in_specs=[
                pl.BlockSpec((tile_r, LANES), in_map),
                pl.BlockSpec((tile_r, LANES), in_map),
            ],
            out_specs=[
                pl.BlockSpec((SUBLANES, LANES), lambda c, j: (c, 0)),
                pl.BlockSpec((SUBLANES, LANES), lambda c, j: (c, 0)),
            ],
        ),
        compiler_params=pltpu.CompilerParams(
            dimension_semantics=("parallel", "arbitrary"),
        ),
    )(pred2d, gt2d)

    # Tiny (<=16,128) partials; single XLA reduce outside the kernel.
    return jnp.sum(sum_part), jnp.sum(cnt_part)


def cow_l1_loss(pred_weights, gt_weights):
    """Pallas implementation of CoW_L1Loss.forward. Returns a (1,) f32 array."""
    pred = jnp.ravel(pred_weights)
    gt = jnp.ravel(gt_weights)
    n = pred.shape[0]

    n_aligned = (n // MIN_BLOCK_ELEMS) * MIN_BLOCK_ELEMS

    total = jnp.float32(0.0)
    count = jnp.float32(0.0)

    if n_aligned > 0:
        if n_aligned == n:
            pred_main, gt_main = pred, gt                  # no copy, no pad
        else:
            pred_main, gt_main = pred[:n_aligned], gt[:n_aligned]
        rows = n_aligned // LANES                          # multiple of 8
        s_main, c_main = _masked_abs_sum(pred_main.reshape(rows, LANES),
                                         gt_main.reshape(rows, LANES),
                                         rows)
        total = total + s_main
        count = count + c_main

    if n_aligned < n:
        # <=1023-element tail handled in plain JAX (avoids a full-array pad/copy).
        p_tail = pred[n_aligned:].astype(jnp.float32)
        g_tail = gt[n_aligned:]
        m = g_tail == 0
        total = total + jnp.sum(jnp.where(m, jnp.abs(p_tail), jnp.float32(0.0)))
        count = count + jnp.sum(m.astype(jnp.float32))

    loss = jnp.where(count > 0, total / count, jnp.float32(0.0))
    # TODO(synk): PyTorch returns a 0-d scalar when gt==0 entries exist and a
    # shape-(1,) tensor otherwise; here we always return shape (1,).
    return loss.reshape(1)


def _reference(pred, gt):
    p = jnp.ravel(pred).astype(jnp.float32)
    g = jnp.ravel(gt).astype(jnp.float32)
    mask = (g == 0.0).astype(jnp.float32)
    cnt = jnp.sum(mask)
    s = jnp.sum(jnp.abs(p - g) * mask)
    return jnp.where(cnt > 0.0, s / cnt, 0.0)


if __name__ == "__main__":
    key = jax.random.PRNGKey(0)
    keys = jax.random.split(key, 7)

    def run_case(shape, zero_frac, k):
        k1, k2, k3 = jax.random.split(k, 3)
        pred = jax.random.normal(k1, shape, dtype=jnp.float32)
        gt_raw = jax.random.uniform(k2, shape, dtype=jnp.float32,
                                    minval=0.1, maxval=1.0)
        drop = jax.random.uniform(k3, shape, dtype=jnp.float32) < zero_frac
        gt = jnp.where(drop, 0.0, gt_raw)   # ~zero_frac of gt entries exactly zero
        loss = jax.block_until_ready(cow_l1_loss(pred, gt))
        ref = _reference(pred, gt)
        assert loss.shape == (1,), loss.shape
        assert jnp.allclose(loss[0], ref, atol=1e-5, rtol=1e-4), (shape, loss, ref)

    # Primary small case: per-pixel weight maps (N, C, H, W) = (2, 4, 16, 16).
    run_case((2, 4, 16, 16), 0.3, keys[0])
    # Ragged tail path (n % 1024 != 0 -> aligned-prefix kernel + pure-JAX tail).
    run_case((3, 5, 7, 11), 0.3, keys[1])
    # Tiny input (< 1024 elements) -> pure-JAX tail only.
    run_case((2, 3, 7, 5), 0.3, keys[2])
    # Multi-block grid, ragged last block (rows=2400, tile_r=2048).
    run_case((2, 4, 300, 128), 0.3, keys[3])
    # Multiple full blocks, no masking (rows=4096, tile_r=2048).
    run_case((1, 8, 256, 256), 0.25, keys[4])
    # Single-block, rows < MAX_TILE_R (rows=800).
    run_case((2, 4, 128, 100), 0.3, keys[5])
    # No gt == 0 entries at all -> loss must be 0.
    run_case((2, 4, 16, 16), 0.0, keys[6])

    print("KERNEL_OK")
</pallas_src>

<mosaic_0001>
module attributes {stable_mosaic.version = 11 : i64} {
  func.func @kernel(%arg0: i32, %arg1: i32, %arg2: memref<16x128xf32, #tpu.memory_space<vmem>>, %arg3: memref<16x128xf32, #tpu.memory_space<vmem>>, %arg4: memref<8x128xf32, #tpu.memory_space<vmem>>, %arg5: memref<8x128xf32, #tpu.memory_space<vmem>>) attributes {dimension_semantics = [#tpu.dimension_semantics<parallel>, #tpu.dimension_semantics<arbitrary>], iteration_bounds = array<i64: 1, 1>, scalar_prefetch = 0 : i64, scratch_operands = 0 : i64, tpu.core_type = #tpu.core_type<tc>, window_params = [{transform_indices = @transform_0, window_bounds = array<i64: 16, 128>}, {transform_indices = @transform_1, window_bounds = array<i64: 16, 128>}, {transform_indices = @transform_2, window_bounds = array<i64: 8, 128>}, {transform_indices = @transform_3, window_bounds = array<i64: 8, 128>}]} {
    %c0_i32 = arith.constant 0 : i32
    %0 = arith.cmpi eq, %arg1, %c0_i32 : i32
    %1 = arith.extui %0 : i1 to i32
    %c0_i32_0 = arith.constant 0 : i32
    %2 = arith.cmpi ne, %1, %c0_i32_0 : i32
    scf.if %2 {
      %cst_17 = arith.constant 0.000000e+00 : f32
      %23 = vector.broadcast %cst_17 : f32 to vector<8x128xf32>
      %c0_18 = arith.constant 0 : index
      %c0_19 = arith.constant 0 : index
      %24 = vector.load %arg4[%c0_18, %c0_19] : memref<8x128xf32, #tpu.memory_space<vmem>>, vector<8x128xf32>
      tpu.vector_store %arg4[%c0_18, %c0_19], %23 {strides = array<i32>} : memref<8x128xf32, #tpu.memory_space<vmem>>, vector<8x128xf32>,
      %cst_20 = arith.constant 0.000000e+00 : f32
      %25 = vector.broadcast %cst_20 : f32 to vector<8x128xf32>
      %c0_21 = arith.constant 0 : index
      %c0_22 = arith.constant 0 : index
      %26 = vector.load %arg5[%c0_21, %c0_22] : memref<8x128xf32, #tpu.memory_space<vmem>>, vector<8x128xf32>
      tpu.vector_store %arg5[%c0_21, %c0_22], %25 {strides = array<i32>} : memref<8x128xf32, #tpu.memory_space<vmem>>, vector<8x128xf32>,
    } else {
    }
    %c0 = arith.constant 0 : index
    %c0_1 = arith.constant 0 : index
    %3 = vector.load %arg3[%c0, %c0_1] : memref<16x128xf32, #tpu.memory_space<vmem>>, vector<16x128xf32>
    %c0_2 = arith.constant 0 : index
    %c0_3 = arith.constant 0 : index
    %4 = vector.load %arg2[%c0_2, %c0_3] : memref<16x128xf32, #tpu.memory_space<vmem>>, vector<16x128xf32>
    %cst = arith.constant 0.000000e+00 : f32
    %5 = vector.broadcast %cst : f32 to vector<16x128xf32>
    %6 = arith.cmpf oeq, %3, %5 : vector<16x128xf32>
    %7 = math.absf %4 : vector<16x128xf32>
    %cst_4 = arith.constant 0.000000e+00 : f32
    %8 = vector.broadcast %cst_4 : f32 to vector<16x128xf32>
    %9 = arith.select %6, %7, %8 : vector<16x128xi1>, vector<16x128xf32>
    %cst_5 = arith.constant 1.000000e+00 : f32
    %cst_6 = arith.constant 0.000000e+00 : f32
    %10 = vector.broadcast %cst_5 : f32 to vector<16x128xf32>
    %11 = vector.broadcast %cst_6 : f32 to vector<16x128xf32>
    %12 = arith.select %6, %10, %11 : vector<16x128xi1>, vector<16x128xf32>
    %c0_7 = arith.constant 0 : index
    %c0_8 = arith.constant 0 : index
    %13 = vector.load %arg4[%c0_7, %c0_8] : memref<8x128xf32, #tpu.memory_space<vmem>>, vector<8x128xf32>
    %14 = vector.shape_cast %9 : vector<16x128xf32> to vector<2x8x128xf32>
    %cst_9 = arith.constant dense<0.000000e+00> : vector<8x128xf32>
    %15 = vector.multi_reduction <add>, %14, %cst_9 [0] : vector<2x8x128xf32> to vector<8x128xf32>
    %16 = arith.addf %13, %15 : vector<8x128xf32>
    %c0_10 = arith.constant 0 : index
    %c0_11 = arith.constant 0 : index
    %17 = vector.load %arg4[%c0_10, %c0_11] : memref<8x128xf32, #tpu.memory_space<vmem>>, vector<8x128xf32>
    tpu.vector_store %arg4[%c0_10, %c0_11], %16 {strides = array<i32>} : memref<8x128xf32, #tpu.memory_space<vmem>>, vector<8x128xf32>,
    %c0_12 = arith.constant 0 : index
    %c0_13 = arith.constant 0 : index
    %18 = vector.load %arg5[%c0_12, %c0_13] : memref<8x128xf32, #tpu.memory_space<vmem>>, vector<8x128xf32>
    %19 = vector.shape_cast %12 : vector<16x128xf32> to vector<2x8x128xf32>
    %cst_14 = arith.constant dense<0.000000e+00> : vector<8x128xf32>
    %20 = vector.multi_reduction <add>, %19, %cst_14 [0] : vector<2x8x128xf32> to vector<8x128xf32>
    %21 = arith.addf %18, %20 : vector<8x128xf32>
    %c0_15 = arith.constant 0 : index
    %c0_16 = arith.constant 0 : index
    %22 = vector.load %arg5[%c0_15, %c0_16] : memref<8x128xf32, #tpu.memory_space<vmem>>, vector<8x128xf32>
    tpu.vector_store %arg5[%c0_15, %c0_16], %21 {strides = array<i32>} : memref<8x128xf32, #tpu.memory_space<vmem>>, vector<8x128xf32>,
    return
  }
  func.func @transform_0(%arg0: i32, %arg1: i32) -> (i32, i32) {
    %c1_i32 = arith.constant 1 : i32
    %0 = arith.muli %arg0, %c1_i32 : i32
    %1 = arith.addi %0, %arg1 : i32
    %c0_i32 = arith.constant 0 : i32
    %c0_i32_0 = arith.constant 0 : i32
    return %1, %c0_i32 : i32, i32
  }
  func.func @transform_1(%arg0: i32, %arg1: i32) -> (i32, i32) {
    %c1_i32 = arith.constant 1 : i32
    %0 = arith.muli %arg0, %c1_i32 : i32
    %1 = arith.addi %0, %arg1 : i32
    %c0_i32 = arith.constant 0 : i32
    %c0_i32_0 = arith.constant 0 : i32
    return %1, %c0_i32 : i32, i32
  }
  func.func @transform_2(%arg0: i32, %arg1: i32) -> (i32, i32) {
    %c0_i32 = arith.constant 0 : i32
    %c0_i32_0 = arith.constant 0 : i32
    return %arg0, %c0_i32 : i32, i32
  }
  func.func @transform_3(%arg0: i32, %arg1: i32) -> (i32, i32) {
    %c0_i32 = arith.constant 0 : i32
    %c0_i32_0 = arith.constant 0 : i32
    return %arg0, %c0_i32 : i32, i32
  }
}

</mosaic_0001>

<bundles_post_ra>
// kernel: tpu_custom_call.1
= control target key start
LH: loop header
LB: loop body
LE: loop exit
PB: predicated region body
PF: predicated region fallthrough
CT: control target
= control target key end

     0   :  { %9 = vsyncpa [#allocation3], 0  ;;  %s245_s0 = inlined_call_operand.hbm [shape: f32[16,128], index: 0, kind: input, shape index: {}]   ;;  %s246_s1 = inlined_call_operand.hbm [shape: f32[16,128], index: 1, kind: input, shape index: {}]   ;;  %s247_s2 = inlined_call_operand.hbm [shape: f32[8,128], index: 2, kind: output, shape index: {0}]   ;;  %s248_s3 = inlined_call_operand.hbm [shape: f32[8,128], index: 3, kind: output, shape index: {1}]  }
   0x1   :  { %10 = vsyncpa [#allocation6], 0 }
   0x2   :  { %11 = vsyncpa [#allocation4], 0 }
   0x3   :  { %12 = vsyncpa [#allocation9], 0  ;;  %s206_s12 = smov [#allocation2]  }
   0x4   :  { %s22_s13 = sshll.u32 %s206_s12, 4  ;;  %s23_s13 = int_to_ptr.vmem [resolvable:$true] %s22_s13 }
   0x5   :  { %s126_s14 = scalar_lea.vmem %s23_s13, 256  ;;  %p131_p1 = scmp.lt.s32.totalorder %s23_s13, %s23_s13 }
   0x6   :  { %p127_p0 = scmp.ne.s32.totalorder %s23_s13, %s126_s14  ;;  %p132_p2 = scmp.lt.s32.totalorder %s126_s14, %s126_s14 }
   0x8   :  { %p133_p3 = por %p132_p2, %p131_p1 }
   0xa   :  { %p134_p4 = pnand %p133_p3, %p127_p0 }
   0xc   :  { %137 = shalt.err (!%p134_p4)
}
   0xd   :  { %s207_s15 = smov 128   ;;  %s208_s16 = smov 8  }
   0xe   :  { %28 = dma.hbm_to_vmem [thread:$0]  %s245_s0, 256, %s23_s13, [#allocation3], %s207_s15, %s207_s15, %s208_s16  }
   0xf   :  { %s209_s19 = smov [#allocation5]  }
  0x10   :  { %s38_s20 = sshll.u32 %s209_s19, 4  ;;  %s39_s20 = int_to_ptr.vmem [resolvable:$true] %s38_s20 }
  0x11   :  { %s146_s21 = scalar_lea.vmem %s39_s20, 256  ;;  %p151_p6 = scmp.lt.s32.totalorder %s39_s20, %s39_s20 }
  0x12   :  { %p147_p5 = scmp.ne.s32.totalorder %s39_s20, %s146_s21  ;;  %p152_p7 = scmp.lt.s32.totalorder %s146_s21, %s146_s21 }
  0x14   :  { %p153_p8 = por %p152_p7, %p151_p6 }
  0x16   :  { %p154_p9 = pnand %p153_p8, %p147_p5 }
  0x18   :  { %157 = shalt.err (!%p154_p9)
}
  0x19   :  { %44 = dma.hbm_to_vmem [thread:$0]  %s246_s1, 256, %s39_s20, [#allocation6], %s207_s15, %s207_s15, %s208_s16  }
  0x1a   :  { %198 = dma.done.wait [#allocation3], 256  }
  0x1b   :  { %199 = vsyncadd [#allocation3], 4294967040 }
  0x1c   :  { %200 = dma.done.wait [#allocation6], 256  }
  0x1d   :  { %201 = vsyncadd [#allocation6], 4294967040  ;;  %v61_v0 = vld [vmem:[#allocation5] sm:$0xff]  ;;  %v62_v1 = vld [vmem:[#allocation5 + $0x8] sm:$0xff]  ;;  %v210_v6 = vmov 0.0   ;;  %s211_s0 = smov [#allocation8]  }
  0x1e   :  { %v63_v2 = vld [vmem:[#allocation2] sm:$0xff]  ;;  %v64_v3 = vld [vmem:[#allocation2 + $0x8] sm:$0xff]  ;;  %vm65_vm0 = vcmp.eq.f32.partialorder %v61_v0, 0.0  ;;  %vm66_vm1 = vcmp.eq.f32.partialorder %v62_v1, 0.0  ;;  %s97_s24 = sshll.u32 %s211_s0, 4  ;;  %s212_s1 = smov [#allocation7]   ;;  %s98_s24 = int_to_ptr.vmem [resolvable:$true] %s97_s24 }
  0x1f   :  { %v67_v4 = vand.u32 2147483647, %v63_v2  ;;  %v68_v5 = vand.u32 2147483647, %v64_v3  ;;  %v71_v7 = vsel %vm65_vm0, 1.0, %v210_v6  ;;  %v72_v8 = vsel %vm66_vm1, 1.0, %v210_v6  ;;  %p163_p11 = scmp.lt.s32.totalorder %s98_s24, %s98_s24 }
  0x20   :  { %v78_v10 = vadd.f32 %v72_v8, %v71_v7  ;;  %s87_s25 = sshll.u32 %s212_s1, 4  ;;  %s158_s26 = scalar_lea.vmem %s98_s24, 128  ;;  %s88_s25 = int_to_ptr.vmem [resolvable:$true] %s87_s25 }
  0x21   :  { %v69_v9 = vsel %vm65_vm0, %v67_v4, 0.0  ;;  %v70_v11 = vsel %vm66_vm1, %v68_v5, 0.0  ;;  %p159_p10 = scmp.ne.s32.totalorder %s98_s24, %s158_s26  ;;  %p164_p12 = scmp.lt.s32.totalorder %s158_s26, %s158_s26 }
  0x22   :  { %v74_v12 = vadd.f32 %v70_v11, %v69_v9  ;;  %80 = vst [vmem:[#allocation8] sm:$0xff] %v78_v10 }
  0x23   :  { %p165_p13 = por %p164_p12, %p163_p11 }
  0x25   :  { %p166_p0 = pnand %p165_p13, %p159_p10 }
  0x27   :  { %169 = shalt.err (!%p166_p0)
}
  0x28   :  { %100 = dma.vmem_to_hbm [thread:$0]  %s98_s24, 128, %s248_s3, [#allocation9]   ;;  %76 = vst [vmem:[#allocation7] sm:$0xff] %v74_v12 }
  0x29   :  { %s178_s29 = scalar_lea.vmem %s88_s25, 128  ;;  %p183_p2 = scmp.lt.s32.totalorder %s88_s25, %s88_s25 }
  0x2a   :  { %p179_p1 = scmp.ne.s32.totalorder %s88_s25, %s178_s29  ;;  %p184_p3 = scmp.lt.s32.totalorder %s178_s29, %s178_s29 }
  0x2c   :  { %p185_p4 = por %p184_p3, %p183_p2 }
  0x2e   :  { %p186_p5 = pnand %p185_p4, %p179_p1 }
  0x30   :  { %189 = shalt.err (!%p186_p5)
}
  0x31   :  { %90 = dma.vmem_to_hbm [thread:$0]  %s88_s25, 128, %s247_s2, [#allocation4]  }
  0x32   :  { %202 = dma.done.wait [#allocation4], 128  }
  0x33   :  { %203 = vsyncadd [#allocation4], 4294967168 }
  0x34   :  { %204 = dma.done.wait [#allocation9], 128  }
  0x35   :  { %205 = vsyncadd [#allocation9], 4294967168 }
  0x36   :  { %107 = vsyncpa [#allocation3], 1 }
  0x37   :  { %108 = vsyncpa [#allocation6], 1 }
  0x38   :  { %109 = vsyncpa [#allocation4], 1 }
  0x39   :  { %110 = vsyncpa [#allocation9], 1 }

</bundles_post_ra>
